<compile_context>
chip_gen: v5e
topology: v5e:2x2
jax: 0.10.0
libtpu: 0.0.40
codegen_flags: <defaults>
</compile_context>

<pallas_src>
import functools

import jax
import jax.numpy as jnp
from jax.experimental import pallas as pl
from jax.experimental.pallas import tpu as pltpu


def _round_up(x, m):
    return (x + m - 1) // m * m


def gru_cell_kernel(xh_ref, w_ref, b_ref, h_ref, out_ref, acc_ref, *, tn, update_bias):
    k = pl.program_id(2)

    # Init the packed-gate accumulator with the (broadcast) bias on the first K step.
    @pl.when(k == 0)
    def _():
        acc_ref[...] = jnp.broadcast_to(b_ref[...].astype(jnp.float32), acc_ref.shape)

    # Single packed matmul: (tm,tk) @ (tk, 3*tn) -> all three gates for this
    # output column tile, accumulated in f32.
    acc_ref[...] += jnp.dot(xh_ref[...], w_ref[...],
                            preferred_element_type=jnp.float32)

    # Fused GRU nonlinearity in the epilogue of the K reduction (f32 VPU/EUP math).
    @pl.when(k == pl.num_programs(2) - 1)
    def _():
        acc = acc_ref[...]
        reset = jax.nn.sigmoid(acc[:, 0 * tn:1 * tn])
        cand = jnp.tanh(reset * acc[:, 1 * tn:2 * tn])
        update = jax.nn.sigmoid(acc[:, 2 * tn:3 * tn] + update_bias)
        h = h_ref[...].astype(jnp.float32)
        out_ref[...] = (h + update * (cand - h)).astype(out_ref.dtype)


def gru_cell_forward(inputs, state, wx, wh, bias, *, update_bias=-1.0,
                     tm=None, tn=None, tk=None,
                     compute_dtype=jnp.bfloat16, out_dtype=jnp.float32):
    """GRUCell forward.

    inputs: [B, inp_size], state: [B, size]
    wx: [inp_size, 3*size], wh: [size, 3*size]  (transpose of nn.Linear weight)
    bias: [1, 3*size] or [3*size]
    returns: [B, size]
    """
    B, inp_size = inputs.shape
    size = state.shape[-1]
    K = inp_size + size

    # ---- tile sizes (multiples of (8, 128); MXU-friendly defaults) ----
    if tm is None:
        tm = min(128, _round_up(B, 8))
    if tn is None:
        tn = 256 if size % 256 == 0 else min(128, _round_up(size, 128))
    if tk is None:
        tk = min(512, _round_up(K, 128))

    Bp = _round_up(B, tm)
    Np = _round_up(size, tn)
    Kp = _round_up(K, tk)
    n_j = Np // tn

    # ---- host-side prep: concat, pad, gate-pack, bf16 cast of matmul operands ----
    xh = jnp.concatenate([inputs, state], axis=-1)            # [B, K]
    w = jnp.concatenate([wx, wh], axis=0)                      # [K, 3*size]
    wr = jnp.pad(w[:, 0 * size:1 * size], ((0, Kp - K), (0, Np - size)))
    wc = jnp.pad(w[:, 1 * size:2 * size], ((0, Kp - K), (0, Np - size)))
    wu = jnp.pad(w[:, 2 * size:3 * size], ((0, Kp - K), (0, Np - size)))
    # Pack gates so each column tile j holds [reset_j | cand_j | update_j] contiguously.
    w_packed = jnp.stack(
        [wr.reshape(Kp, n_j, tn), wc.reshape(Kp, n_j, tn), wu.reshape(Kp, n_j, tn)],
        axis=2).reshape(Kp, n_j * 3 * tn).astype(compute_dtype)

    b3 = jnp.pad(jnp.reshape(bias, (3, size)).astype(jnp.float32),
                 ((0, 0), (0, Np - size)))                     # rows: reset, cand, update
    b_packed = jnp.transpose(b3.reshape(3, n_j, tn), (1, 0, 2)).reshape(1, n_j * 3 * tn)

    xh = jnp.pad(xh, ((0, Bp - B), (0, Kp - K))).astype(compute_dtype)
    h = jnp.pad(state, ((0, Bp - B), (0, Np - size))).astype(jnp.float32)

    grid = (Bp // tm, n_j, Kp // tk)
    kernel = functools.partial(gru_cell_kernel, tn=tn, update_bias=float(update_bias))

    out = pl.pallas_call(
        kernel,
        out_shape=jax.ShapeDtypeStruct((Bp, Np), out_dtype),
        grid_spec=pltpu.PrefetchScalarGridSpec(
            num_scalar_prefetch=0,
            grid=grid,
            in_specs=[
                pl.BlockSpec((tm, tk), lambda i, j, k: (i, k)),       # xh
                pl.BlockSpec((tk, 3 * tn), lambda i, j, k: (k, j)),   # packed gate weights
                pl.BlockSpec((1, 3 * tn), lambda i, j, k: (0, j)),    # packed gate bias
                pl.BlockSpec((tm, tn), lambda i, j, k: (i, j)),       # h (state)
            ],
            out_specs=pl.BlockSpec((tm, tn), lambda i, j, k: (i, j)),
            scratch_shapes=[
                pltpu.VMEM((tm, 3 * tn), jnp.float32),   # packed gate accumulator
            ],
        ),
        compiler_params=pltpu.CompilerParams(
            dimension_semantics=("parallel", "parallel", "arbitrary"),
            vmem_limit_bytes=48 * 1024 * 1024,
        ),
    )(xh, w_packed, b_packed, h)

    return out[:B, :size]


def gru_cell_reference(inputs, state, wx, wh, bias, *, update_bias=-1.0):
    size = state.shape[-1]
    hp = jax.lax.Precision.HIGHEST
    parts = (jnp.dot(inputs, wx, precision=hp)
             + jnp.dot(state, wh, precision=hp)
             + jnp.reshape(bias, (1, 3 * size)))
    reset, cand, update = jnp.split(parts, 3, axis=-1)
    reset = jax.nn.sigmoid(reset)
    cand = jnp.tanh(reset * cand)
    update = jax.nn.sigmoid(update + update_bias)
    return update * cand + (1.0 - update) * state


if __name__ == "__main__":
    # Small, lane-aligned test shapes.
    B = 16
    INP_SIZE = 256
    SIZE = 256

    key = jax.random.PRNGKey(0)
    k_x, k_h, k_w, k_b = jax.random.split(key, 4)

    inputs = jax.random.normal(k_x, (B, INP_SIZE), dtype=jnp.float32)
    state = jax.random.normal(k_h, (B, SIZE), dtype=jnp.float32)

    # Deterministic params for nn.Linear(inp_size + size, 3*size, bias=True).
    fan_in = INP_SIZE + SIZE
    bound = float(fan_in) ** -0.5
    w_full = jax.random.uniform(k_w, (fan_in, 3 * SIZE), jnp.float32, -bound, bound)
    bias = jax.random.uniform(k_b, (1, 3 * SIZE), jnp.float32, -bound, bound)
    wx = w_full[:INP_SIZE, :]
    wh = w_full[INP_SIZE:, :]

    ref = gru_cell_reference(inputs, state, wx, wh, bias, update_bias=-1.0)

    # 1) Exact-precision run (f32 matmul operands) with small tiles to exercise
    #    the full (i, j, k) grid = (2, 2, 4) and the accumulate/epilogue path.
    out_f32 = gru_cell_forward(inputs, state, wx, wh, bias, update_bias=-1.0,
                               tm=8, tn=128, tk=128, compute_dtype=jnp.float32)
    out_f32 = jax.block_until_ready(out_f32)
    assert out_f32.shape == (B, SIZE)
    assert jnp.allclose(out_f32, ref, atol=1e-4, rtol=1e-4), "f32 path mismatch vs reference"

    # 2) Performance config: bf16 matmul operands (f32 accumulation), default tiles.
    out_bf16 = gru_cell_forward(inputs, state, wx, wh, bias, update_bias=-1.0)
    out_bf16 = jax.block_until_ready(out_bf16)
    assert out_bf16.shape == (B, SIZE)
    assert jnp.allclose(out_bf16, ref, atol=2e-2, rtol=2e-2), "bf16 path mismatch vs reference"

    print("KERNEL_OK")
</pallas_src>

<mosaic_0001>
module attributes {stable_mosaic.version = 11 : i64} {
  func.func @gru_cell_kernel(%arg0: i32, %arg1: i32, %arg2: i32, %arg3: memref<8x128xf32, #tpu.memory_space<vmem>>, %arg4: memref<128x384xf32, #tpu.memory_space<vmem>>, %arg5: memref<1x384xf32, #tpu.memory_space<vmem>>, %arg6: memref<8x128xf32, #tpu.memory_space<vmem>>, %arg7: memref<8x128xf32, #tpu.memory_space<vmem>>, %arg8: memref<8x384xf32, #tpu.memory_space<vmem>>) attributes {dimension_semantics = [#tpu.dimension_semantics<parallel>, #tpu.dimension_semantics<parallel>, #tpu.dimension_semantics<arbitrary>], iteration_bounds = array<i64: 2, 2, 4>, scalar_prefetch = 0 : i64, scratch_operands = 1 : i64, tpu.core_type = #tpu.core_type<tc>, window_params = [{transform_indices = @transform_0, window_bounds = array<i64: 8, 128>}, {transform_indices = @transform_1, window_bounds = array<i64: 128, 384>}, {transform_indices = @transform_2, window_bounds = array<i64: 1, 384>}, {transform_indices = @transform_3, window_bounds = array<i64: 8, 128>}, {transform_indices = @transform_4, window_bounds = array<i64: 8, 128>}]} {
    %c0_i32 = arith.constant 0 : i32
    %0 = arith.cmpi eq, %arg2, %c0_i32 : i32
    %1 = arith.extui %0 : i1 to i32
    %c0_i32_0 = arith.constant 0 : i32
    %2 = arith.cmpi ne, %1, %c0_i32_0 : i32
    scf.if %2 {
      %c0_9 = arith.constant 0 : index
      %c0_10 = arith.constant 0 : index
      %12 = vector.load %arg5[%c0_9, %c0_10] : memref<1x384xf32, #tpu.memory_space<vmem>>, vector<1x384xf32>
      %13 = vector.shape_cast %12 : vector<1x384xf32> to vector<1x384xf32>
      %14 = vector.broadcast %13 : vector<1x384xf32> to vector<8x384xf32>
      %c0_11 = arith.constant 0 : index
      %c0_12 = arith.constant 0 : index
      %15 = vector.load %arg8[%c0_11, %c0_12] : memref<8x384xf32, #tpu.memory_space<vmem>>, vector<8x384xf32>
      tpu.vector_store %arg8[%c0_11, %c0_12], %14 {strides = array<i32>} : memref<8x384xf32, #tpu.memory_space<vmem>>, vector<8x384xf32>,
    } else {
    }
    %c0 = arith.constant 0 : index
    %c0_1 = arith.constant 0 : index
    %3 = vector.load %arg8[%c0, %c0_1] : memref<8x384xf32, #tpu.memory_space<vmem>>, vector<8x384xf32>
    %c0_2 = arith.constant 0 : index
    %c0_3 = arith.constant 0 : index
    %4 = vector.load %arg3[%c0_2, %c0_3] : memref<8x128xf32, #tpu.memory_space<vmem>>, vector<8x128xf32>
    %c0_4 = arith.constant 0 : index
    %c0_5 = arith.constant 0 : index
    %5 = vector.load %arg4[%c0_4, %c0_5] : memref<128x384xf32, #tpu.memory_space<vmem>>, vector<128x384xf32>
    %cst = arith.constant dense<0.000000e+00> : vector<8x384xf32>
    %6 = tpu.matmul %4, %5, %cst {dimension_numbers = #tpu.dot_dimension_numbers<[1], [0], [0], [1], [0, 0, 1, 1], [], []>} : vector<8x128xf32>, vector<128x384xf32>, vector<8x384xf32> -> vector<8x384xf32>
    %7 = arith.addf %3, %6 : vector<8x384xf32>
    %c0_6 = arith.constant 0 : index
    %c0_7 = arith.constant 0 : index
    %8 = vector.load %arg8[%c0_6, %c0_7] : memref<8x384xf32, #tpu.memory_space<vmem>>, vector<8x384xf32>
    tpu.vector_store %arg8[%c0_6, %c0_7], %7 {strides = array<i32>} : memref<8x384xf32, #tpu.memory_space<vmem>>, vector<8x384xf32>,
    %c3_i32 = arith.constant 3 : i32
    %9 = arith.cmpi eq, %arg2, %c3_i32 : i32
    %10 = arith.extui %9 : i1 to i32
    %c0_i32_8 = arith.constant 0 : i32
    %11 = arith.cmpi ne, %10, %c0_i32_8 : i32
    scf.if %11 {
      %c0_9 = arith.constant 0 : index
      %c0_10 = arith.constant 0 : index
      %12 = vector.load %arg8[%c0_9, %c0_10] : memref<8x384xf32, #tpu.memory_space<vmem>>, vector<8x384xf32>
      %13 = vector.extract_strided_slice %12 {offsets = [0, 0], sizes = [8, 128], strides = [1, 1]} : vector<8x384xf32> to vector<8x128xf32>
      %14 = arith.negf %13 : vector<8x128xf32>
      %15 = math.exp %14 : vector<8x128xf32>
      %cst_11 = arith.constant 1.000000e+00 : f32
      %16 = vector.broadcast %cst_11 : f32 to vector<8x128xf32>
      %17 = arith.addf %16, %15 : vector<8x128xf32>
      %18 = arith.divf %16, %17 : vector<8x128xf32>
      %19 = vector.extract_strided_slice %12 {offsets = [0, 128], sizes = [8, 128], strides = [1, 1]} : vector<8x384xf32> to vector<8x128xf32>
      %20 = arith.mulf %18, %19 : vector<8x128xf32>
      %21 = math.tanh %20 : vector<8x128xf32>
      %22 = vector.extract_strided_slice %12 {offsets = [0, 256], sizes = [8, 128], strides = [1, 1]} : vector<8x384xf32> to vector<8x128xf32>
      %cst_12 = arith.constant -1.000000e+00 : f32
      %23 = vector.broadcast %cst_12 : f32 to vector<8x128xf32>
      %24 = arith.addf %22, %23 : vector<8x128xf32>
      %25 = arith.negf %24 : vector<8x128xf32>
      %26 = math.exp %25 : vector<8x128xf32>
      %cst_13 = arith.constant 1.000000e+00 : f32
      %27 = vector.broadcast %cst_13 : f32 to vector<8x128xf32>
      %28 = arith.addf %27, %26 : vector<8x128xf32>
      %29 = arith.divf %27, %28 : vector<8x128xf32>
      %c0_14 = arith.constant 0 : index
      %c0_15 = arith.constant 0 : index
      %30 = vector.load %arg6[%c0_14, %c0_15] : memref<8x128xf32, #tpu.memory_space<vmem>>, vector<8x128xf32>
      %31 = arith.subf %21, %30 : vector<8x128xf32>
      %32 = arith.mulf %29, %31 : vector<8x128xf32>
      %33 = arith.addf %30, %32 : vector<8x128xf32>
      %c0_16 = arith.constant 0 : index
      %c0_17 = arith.constant 0 : index
      %34 = vector.load %arg7[%c0_16, %c0_17] : memref<8x128xf32, #tpu.memory_space<vmem>>, vector<8x128xf32>
      tpu.vector_store %arg7[%c0_16, %c0_17], %33 {strides = array<i32>} : memref<8x128xf32, #tpu.memory_space<vmem>>, vector<8x128xf32>,
    } else {
    }
    return
  }
  func.func @transform_0(%arg0: i32, %arg1: i32, %arg2: i32) -> (i32, i32) {
    %c0_i32 = arith.constant 0 : i32
    return %arg0, %arg2 : i32, i32
  }
  func.func @transform_1(%arg0: i32, %arg1: i32, %arg2: i32) -> (i32, i32) {
    %c0_i32 = arith.constant 0 : i32
    return %arg2, %arg1 : i32, i32
  }
  func.func @transform_2(%arg0: i32, %arg1: i32, %arg2: i32) -> (i32, i32) {
    %c0_i32 = arith.constant 0 : i32
    %c0_i32_0 = arith.constant 0 : i32
    return %c0_i32, %arg1 : i32, i32
  }
  func.func @transform_3(%arg0: i32, %arg1: i32, %arg2: i32) -> (i32, i32) {
    %c0_i32 = arith.constant 0 : i32
    return %arg0, %arg1 : i32, i32
  }
  func.func @transform_4(%arg0: i32, %arg1: i32, %arg2: i32) -> (i32, i32) {
    %c0_i32 = arith.constant 0 : i32
    return %arg0, %arg1 : i32, i32
  }
}

</mosaic_0001>

<bundles_post_ra>
// kernel: tpu_custom_call.1
= control target key start
LH: loop header
LB: loop body
LE: loop exit
PB: predicated region body
PF: predicated region fallthrough
CT: control target
= control target key end

     0   :  { %s1751_s0 = inlined_call_operand.hbm [shape: f32[16,512], index: 0, kind: input, shape index: {}]   ;;  %s1752_s1 = inlined_call_operand.hbm [shape: f32[512,768], index: 1, kind: input, shape index: {}]   ;;  %s1753_s2 = inlined_call_operand.hbm [shape: f32[1,768], index: 2, kind: input, shape index: {}]   ;;  %s1754_s3 = inlined_call_operand.hbm [shape: f32[16,256], index: 3, kind: input, shape index: {}]   ;;  %s1755_s4 = inlined_call_operand.hbm [shape: f32[16,256], index: 4, kind: output, shape index: {}]  }
   0x1   :  { %1771 = sst [smem:[#allocation32_spill]] %s1751_s0 }
   0x2   :  { %1772 = sst [smem:[#allocation33_spill]] %s1752_s1 }
   0x3   :  { %1773 = sst [smem:[#allocation34_spill]] %s1753_s2 }
   0x4   :  { %1774 = sst [smem:[#allocation35_spill]] %s1754_s3 }
   0x5   :  { %1775 = sst [smem:[#allocation36_spill]] %s1755_s4 }
   0x6   :  { %9 = vsyncpa [#allocation4], 0 }
   0x7   :  { %11 = vsyncpa [#allocation4 + $0x1], 0 }
   0x8   :  { %12 = vsyncpa [#allocation7], 0 }
   0x9   :  { %14 = vsyncpa [#allocation7 + $0x1], 0 }
   0xa   :  { %15 = vsyncpa [#allocation10], 0 }
   0xb   :  { %17 = vsyncpa [#allocation10 + $0x1], 0 }
   0xc   :  { %18 = vsyncpa [#allocation5], 0 }
   0xd   :  { %20 = vsyncpa [#allocation5 + $0x1], 0  ;;  %s1308_s15 = smov 0   ;;  %s1310_s16 = smov 0  }
   0xe   :  { %s1312_s17 = smov 0   ;;  %s1314_s18 = smov 0  }
   0xf   :  { %s1316_s19 = smov 0   ;;  %s1318_s20 = smov 0  }
  0x10   :  { %s1320_s21 = smov 0   ;;  %s1322_s22 = smov 0  }
  0x11   :  { %s1324_s23 = smov 0   ;;  %s1326_s24 = smov 0  }
  0x12   :  { %s1328_s25 = smov 0   ;;  %s1330_s26 = smov 0  }
  0x13   :  { %s1332_s27 = smov 0   ;;  %s1334_s28 = smov 0  }
  0x14   :  { %s1336_s29 = smov 0   ;;  %s1338_s30 = smov 0  }
  0x15   :  { %s1340_s5 = smov 0   ;;  %s1342_s6 = smov 0  }
  0x16   :  { %s1344_s7 = smov 0  }
  0x17 LB: > { %1776 = sst [smem:[#allocation17_spill]] %s1234_s22  ;;  %p62_p0 = scmp.eq.s32.totalorder %s1278_s7, 0  ;;  %s1278_s7 = sphi %s1344_s7, %s26_s7   ;;  %s1274_s6 = sphi %s1342_s6, %s1840_s6   ;;  %s1270_s5 = sphi %s1340_s5, %s1839_s5   ;;  %s1266_s30 = sphi %s1338_s30, %s1838_s30   ;;  %s1262_s29 = sphi %s1336_s29, %s1824_s29   ;;  %s1258_s28 = sphi %s1334_s28, %s1837_s28   ;;  %s1254_s27 = sphi %s1332_s27, %s1823_s27   ;;  %s1250_s26 = sphi %s1330_s26, %s1836_s26   ;;  %s1246_s25 = sphi %s1328_s25, %s1835_s25   ;;  %s1242_s24 = sphi %s1326_s24, %s1821_s24   ;;  %s1238_s23 = sphi %s1324_s23, %s1834_s23   ;;  %s1234_s22 = sphi %s1322_s22, %s1819_s22   ;;  %s1230_s21 = sphi %s1320_s21, %s1818_s21   ;;  %s1226_s20 = sphi %s1318_s20, %s1833_s20   ;;  %s1222_s19 = sphi %s1316_s19, %s1832_s19   ;;  %s1218_s18 = sphi %s1314_s18, %s1831_s18   ;;  %s1214_s17 = sphi %s1312_s17, %s1830_s17   ;;  %s1210_s16 = sphi %s1310_s16, %s1828_s16   ;;  %s1206_s15 = sphi %s1308_s15, %s1826_s15  }
  0x18   : > { %1777 = sst [smem:[#allocation18_spill]] %s1238_s23  ;;  %p89_p1 = scmp.ne.s32.totalorder %s1238_s23, %s1234_s22 }
  0x19   : > { %1778 = sst [smem:[#allocation19_spill]] %s1246_s25  ;;  %p95_p2 = scmp.ne.s32.totalorder %s1234_s22, %s1230_s21 }
  0x1a   : > { %1779 = sst [smem:[#allocation20_spill]] %s1254_s27  ;;  %p1768_p3 = scmp.lt.s32.totalorder %s1278_s7, 16 }
  0x1b   : > { %1780 = sst [smem:[#allocation21_spill]] %s1258_s28  ;;  %p91_p4 = por %p89_p1, %p62_p0 }
  0x1c   : > { %1781 = sst [smem:[#allocation22_spill]] %s1262_s29  ;;  %s222_s9 = sand.u32 1, %s1278_s7  }
  0x1d   : > { %1782 = sst [smem:[#allocation23_spill]] %s1266_s30  ;;  %s224_s10 = sand.u32 1, %s1238_s23  }
  0x1e   : > { %1783 = sst [smem:[#allocation24_spill]] %s1274_s6  ;;  %s761_s11 = smul.u32 384, %s224_s10 }
  0x1f   : > { %p1416_p5 = pnand %p1768_p3, %p91_p4  ;;  %s1757_s13 = smul.u32 3, %s1270_s5 }
  0x20   : > { %s762_s14 = smul.u32 96, %s1266_s30  ;;  %s226_s4 = scalar_lea.vmem [#allocation6], %s761_s11 }
  0x21   : > { %s237_s8 = sshll.u32 %s226_s4, 4  ;;  %s1785_s1 = sld [smem:[#allocation33_spill]]  ;;  %s238_s8 = int_to_ptr.vmem [resolvable:$true] %s237_s8 }
  0x22   : > { %s232_s28 = sadd.s32 %s762_s14, %s1757_s13  ;;  %p748_p6 = scmp.ge.s32.totalorder %s1278_s7, 1 }
  0x23   : > { %s744_s29 = sshll.u32 %s232_s28, 3  ;;  %p285_p7 = scmp.lt.s32.totalorder %s1278_s7, 17 }
  0x24   : > { %s1429_s4 = scalar_lea.sflag [#allocation7], %s222_s9  ;;  %s1280_s11 = smov 768  }
  0x25   : > { %s1281_s28 = smov 384   ;;  %s1282_s3 = smov 24  }
  0x26   : > { %p1434_p8 = pnand %p748_p6, %p285_p7  ;;  %s38_s9 = sadd.s32 1, %s1266_s30 }
  0x27   : > { %s234_s10 = scalar_lea.hbm %s1785_s1, %s744_s29  ;;  %s1439_s29 = sadd.s32 4294967295, %s1278_s7  }
  0x28   : > { %s235_s2 = sshll.u32 %s234_s10, 4  ;;  %s41_s14 = sadd.s32 1, %s1270_s5  ;;  %s236_s2 = int_to_ptr.hbm [resolvable:$true] %s235_s2 }
  0x29   : > { %782 = dma.hbm_to_vmem [thread:$0]  (!%p1416_p5), %s236_s2, 6144, %s238_s8, %s1429_s4, %s1280_s11, %s1281_s28, %s1282_s3  }
  0x2a   : > { %p39_p9 = scmp.ge.s32.totalorder %s38_s9, 4  ;;  %s45_s10 = sadd.s32 1, %s1274_s6 }
  0x2b   : > { %s54_s13 = sadd.s32 1, %s1250_s26  ;;  %p61_p10 = scmp.ne.s32.totalorder %s1250_s26, %s1246_s25 }
  0x2c   : > { %s1842_s9 = smov (%p39_p9, %s38_s9), 0  ;;  %s1844_s14 = smov (!%p39_p9, %s41_s14), %s1270_s5 }
  0x2d   : > { %1787 = sst [smem:[#allocation25_spill]] %s1842_s9  ;;  %s50_s2 = ssub.s32 %s1266_s30, %s1842_s9 }
  0x2e   : > { %p1454_p11 = por %p62_p0, %p61_p10  ;;  %p43_p12 = scmp.ge.s32.totalorder %s1844_s14, 2 }
  0x2f   : > { %p67_p13 = scmp.ne.s32.totalorder %s1246_s25, %s1242_s24  ;;  %p68_p1 = scmp.eq.s32.totalorder %s1439_s29, 0 }
  0x30   : > { %s201_s12 = sand.u32 1, %s1250_s26   ;;  %s1846_s14 = smov (%p43_p12, %s1844_s14), 0 }
  0x31   : > { %1789 = sst [smem:[#allocation26_spill]] %s1846_s14  ;;  %s1848_s10 = smov (!%p43_p12, %s45_s10), %s1274_s6 }
  0x32   : > { %p1467_p4 = por %p68_p1, %p67_p13  ;;  %s1473_s28 = ssub.s32 %s1270_s5, %s1846_s14 }
  0x33   : > { %p47_p5 = scmp.ge.s32.totalorder %s1848_s10, 2  ;;  %s79_s3 = sor.u32 %s1473_s28, %s50_s2 }
  0x34   : > { %s1790_s11 = scalar_select %p1467_p4, 1, 0 }
  0x35   : > { %p80_p6 = scmp.eq.s32.totalorder %s79_s3, 0  ;;  %p1481_p7 = por %p95_p2, %p68_p1 }
  0x36   : > { %1791 = sst [smem:[#allocation27_spill]] %s1790_s11  ;;  %s1850_s10 = smov (%p47_p5, %s1848_s10), 0 }
  0x37   : > { %s1792_s24 = scalar_select %p1481_p7, 1, 0 }
  0x38   : > { %1794 = sst [smem:[#allocation29_spill]] %s1850_s10  ;;  %s1795_s1 = sadd.s32 1, %s1238_s23 }
  0x39   : > { %1793 = sst [smem:[#allocation28_spill]] %s1792_s24  ;;  %s1494_s14 = ssub.s32 %s1274_s6, %s1850_s10 }
  0x3a   : > { %s1490_s9 = scalar_select %p80_p6, %s1238_s23, %s1795_s1  }
  0x3b   : > { %s51_s11 = sor.u32 %s50_s2, %s1494_s14  ;;  %s739_s25 = sshll.u32 %s201_s12, 3 }
  0x3c   : > { %1796 = sst [smem:[#allocation30_spill]] %s1490_s9  ;;  %p52_p9 = scmp.eq.s32.totalorder %s51_s11, 0 }
  0x3d   : > { %s740_s21 = sshll.u32 %s1274_s6, 2  ;;  %s205_s3 = scalar_lea.vmem [#allocation3], %s739_s25 }
  0x3e   : > { %s215_s24 = sshll.u32 %s205_s3, 4  ;;  %s209_s1 = sadd.s32 %s1266_s30, %s740_s21  ;;  %s216_s24 = int_to_ptr.vmem [resolvable:$true] %s215_s24 }
  0x3f   : > { %s1499_s22 = scalar_select %p52_p9, %s1250_s26, %s54_s13  }
  0x40   : > { %s741_s2 = sshll.u32 %s209_s1, 3  ;;  %p777_p2 = pnand %p1768_p3, %p1454_p11 }
  0x41   : > { %1797 = sst [smem:[#allocation31_spill]] %s1499_s22  ;;  %s202_s25 = scalar_lea.sflag [#allocation4], %s201_s12 }
  0x42   : > { %s1798_s0 = sld [smem:[#allocation32_spill]]  ;;  %p106_p10 = scmp.eq.s32.totalorder %s1473_s28, 0 }
  0x43   : > { %s108_s13 = sadd.s32 1, %s1226_s20  ;;  %p115_p12 = scmp.ne.s32.totalorder %s1226_s20, %s1222_s19 }
  0x44   : > { %p121_p13 = scmp.ne.s32.totalorder %s1222_s19, %s1218_s18  ;;  %s1800_s10 = smul.u32 3, %s1270_s5 }
  0x45   : > { %s1516_s8 = scalar_select %p106_p10, %s1226_s20, %s108_s13  }
  0x46   : > { %p117_p11 = por %p115_p12, %p62_p0  ;;  %p1522_p5 = por %p121_p13, %p68_p1 }
  0x47   : > { %s1801_s21 = sld [smem:[#allocation34_spill]]  ;;  %s133_s13 = sor.u32 %s1473_s28, %s1494_s14 }
  0x48   : > { %s211_s9 = scalar_lea.hbm %s1798_s0, %s741_s2  ;;  %p783_p6 = pnand %p1768_p3, %p117_p11 }
  0x49   : > { %s213_s23 = sshll.u32 %s211_s9, 4  ;;  %p134_p9 = scmp.eq.s32.totalorder %s133_s13, 0  ;;  %s214_s23 = int_to_ptr.hbm [resolvable:$true] %s213_s23 }
  0x4a   : > { %779 = dma.hbm_to_vmem [thread:$0]  (!%p777_p2), %s214_s23, 128, %s216_s24, %s202_s25  }
  0x4b   : > { %s249_s23 = sand.u32 1, %s1226_s20   ;;  %s736_s25 = sadd.s32 4294967294, %s1278_s7  }
  0x4c   : > { %s763_s3 = smul.u32 3, %s249_s23  ;;  %s136_s12 = sadd.s32 1, %s1214_s17 }
  0x4d   : > { %s255_s18 = scalar_lea.hbm %s1801_s21, %s1800_s10  ;;  %p143_p2 = scmp.ne.s32.totalorder %s1214_s17, %s1210_s16 }
  0x4e   : > { %s257_s1 = sshll.u32 %s255_s18, 4  ;;  %s251_s2 = scalar_lea.vmem [#allocation8], %s763_s3  ;;  %s258_s1 = int_to_ptr.hbm [resolvable:$true] %s257_s1 }
  0x4f   : > { %s259_s11 = sshll.u32 %s251_s2, 4  ;;  %p149_p10 = scmp.ne.s32.totalorder %s1210_s16, %s1206_s15  ;;  %s260_s11 = int_to_ptr.vmem [resolvable:$true] %s259_s11 }
  0x50   : > { %785 = dma.hbm_to_vmem [thread:$0]  (!%p783_p6), %s258_s1, 48, %s260_s11, %s1429_s4  }
  0x51   : > { %s1544_s23 = scalar_select %p134_p9, %s1214_s17, %s136_s12  }
  0x52   : > { %p1548_p12 = por %p143_p2, %p62_p0  ;;  %p1554_p13 = por %p149_p10, %p68_p1 }
  0x53   : > { %p175_p11 = scmp.eq.s32.totalorder %s1439_s29, 15  ;;  %p181_p6 = scmp.eq.s32.totalorder %s736_s25, 15 }
  0x54   : > { %s266_s4 = sand.u32 1, %s1214_s17   ;;  %s746_s14 = sshll.u32 %s1274_s6, 1 }
  0x55   : > { %p1561_p3 = por %p175_p11, %p143_p2  ;;  %p1565_p9 = por %p181_p6, %p149_p10 }
  0x56   : > { %s745_s18 = sshll.u32 %s266_s4, 3  ;;  %s274_s3 = sadd.s32 %s1270_s5, %s746_s14 }
  0x57   : > { %s747_s1 = sshll.u32 %s274_s3, 3  ;;  %s270_s2 = scalar_lea.vmem [#allocation9], %s745_s18 }
  0x58   : > { %s280_s11 = sshll.u32 %s270_s2, 4  ;;  %s1806_s0 = sld [smem:[#allocation35_spill]]  ;;  %s281_s11 = int_to_ptr.vmem [resolvable:$true] %s280_s11 }
  0x59   : > { %p1807_p0 = scmp.lt.s32.totalorder %s1278_s7, 16  ;;  %s267_s6 = scalar_lea.sflag [#allocation10], %s266_s4 }
  0x5a   : > { %s1808_s22 = sld [smem:[#allocation19_spill]] (!%p1434_p8) }
  0x5b   : > { %p786_p1 = pnand %p1807_p0, %p1548_p12 }
  0x5c   : > { %289 = sbr.rel (%p1434_p8) target bundleno = 376 (0x178), region = 36 }
  0x5e   : > { %s276_s30 = scalar_lea.hbm %s1806_s0, %s747_s1 }
  0x5f   : > { %s278_s25 = sshll.u32 %s276_s30, 4  ;;  %s279_s25 = int_to_ptr.hbm [resolvable:$true] %s278_s25 }
  0x60   : > { %788 = dma.hbm_to_vmem [thread:$0]  (!%p786_p1), %s279_s25, 128, %s281_s11, %s267_s6  }
  0x61   : > { %s291_s3 = sand.u32 1, %s1808_s22  }
  0x62   : > { %s1580_s18 = sshll.u32 %s291_s3, 3  ;;  %s292_s2 = scalar_lea.sflag [#allocation4], %s291_s3 }
  0x63   : > { %s295_s13 = scalar_lea.vmem [#allocation3], %s1580_s18 }
  0x64   : > { %1185 = dma.done.wait (%p1467_p4), %s292_s2, 128  }
  0x65   : > { %1187 = vsyncadd (%p1467_p4), %s292_s2, 4294967168  ;;  %s1810_s0 = sld [smem:[#allocation17_spill]]  ;;  %s301_s6 = sand.u32 1, %s1439_s29  }
  0x66   : > { %s302_s4 = scalar_lea.sflag [#allocation7], %s301_s6 }
  0x6b   : > { %s303_s10 = sand.u32 1, %s1810_s0  }
  0x6c   : > { %s764_s27 = smul.u32 384, %s303_s10 }
  0x6e   : > { %s1589_s1 = scalar_lea.vmem [#allocation6], %s764_s27 }
  0x6f   : > { %1189 = dma.done.wait (%p1481_p7), %s302_s4, 6144  }
  0x70   : > { %1191 = vsyncadd (%p1481_p7), %s302_s4, 4294961152  ;;  %s313_s22 = sand.u32 1, %s1222_s19  }
  0x71   : > { %s765_s11 = smul.u32 3, %s313_s22 }
  0x73   : > { %s315_s12 = scalar_lea.vmem [#allocation8], %s765_s11 }
  0x74   : > { %1193 = dma.done.wait (%p1522_p5), %s302_s4, 48  }
  0x75   : > { %1195 = vsyncadd (%p1522_p5), %s302_s4, 4294967248  ;;  %s1601_s29 = sand.u32 1, %s1210_s16  }
  0x76   : > { %s750_s25 = sshll.u32 %s1601_s29, 3  ;;  %s322_s14 = scalar_lea.sflag [#allocation10], %s1601_s29 }
  0x77   : > { %s1605_s3 = scalar_lea.vmem [#allocation9], %s750_s25 }
  0x78   : > { %1197 = dma.done.wait (%p1554_p13), %s322_s14, 128  }
  0x79   : > { %1199 = vsyncadd (%p1554_p13), %s322_s14, 4294967168  ;;  %s1611_s2 = scalar_lea.vmem [#allocation11], %s750_s25  ;;  %s1812_s0 = sld [smem:[#allocation20_spill]] }
  0x7f   : > { %p752_p8 = scmp.ne.s32.totalorder %s1812_s0, 0 }
  0x81   : > { %372 = sbr.rel (%p752_p8) target bundleno = 140 (0x8c), region = 56 }
  0x86   : > { %v373_v0 = vld [vmem:[%s315_s12] sm:$0x7] }
  0x87   : > { %v375_v1 = vperm.slane %v373_v0, 0  ;;  %v376_v2 = vperm.slane %v373_v0, 1  ;;  %v377_v3 = vperm.slane %v373_v0, 2 }
  0x89   : > { %381 = vst [vmem:[#allocation2 + $0x10] sm:$0xff] %v375_v1 }
  0x8a   : > { %382 = vst [vmem:[#allocation2] sm:$0xff] %v376_v2 }
  0x8b   : > { %383 = vst [vmem:[#allocation2 + $0x8] sm:$0xff] %v377_v3 }
  0x8c PF: > { %v435_v4 = vld [vmem:[%s1589_s1 + $0x178] sm:$0xff]  ;;  %v432_v5 = vld [vmem:[%s1589_s1 + $0x160] sm:$0xff]  ;;  %v433_v6 = vld [vmem:[%s1589_s1 + $0x168] sm:$0xff]  ;;  %s1813_s9 = sld [smem:[#allocation20_spill]] }
  0x8d   : > { %476 = vmatpush.msra.mxu2 %v435_v4  ;;  %v434_v7 = vld [vmem:[%s1589_s1 + $0x170] sm:$0xff]  ;;  %v429_v8 = vld [vmem:[%s1589_s1 + $0x148] sm:$0xff]  ;;  %436 = vmatpush.msra.mxu0 %v433_v6  ;;  %v431_v10 = vld [vmem:[%s1589_s1 + $0x158] sm:$0xff] }
  0x8e   : > { %456 = vmatpush.msra.mxu1 %v434_v7  ;;  %v430_v9 = vld [vmem:[%s1589_s1 + $0x150] sm:$0xff]  ;;  %v427_v11 = vld [vmem:[%s1589_s1 + $0x138] sm:$0xff]  ;;  %v428_v12 = vld [vmem:[%s1589_s1 + $0x140] sm:$0xff] }
  0x8f   : > { %477 = vmatpush.msra.mxu2 %v432_v5  ;;  %v426_v13 = vld [vmem:[%s1589_s1 + $0x130] sm:$0xff]  ;;  %437 = vmatpush.msra.mxu0 %v430_v9  ;;  %v424_v14 = vld [vmem:[%s1589_s1 + $0x120] sm:$0xff]  ;;  %v425_v15 = vld [vmem:[%s1589_s1 + $0x128] sm:$0xff] }
  0x90   : > { %457 = vmatpush.msra.mxu1 %v431_v10  ;;  %v423_v16 = vld [vmem:[%s1589_s1 + $0x118] sm:$0xff]  ;;  %v421_v17 = vld [vmem:[%s1589_s1 + $0x108] sm:$0xff]  ;;  %v422_v18 = vld [vmem:[%s1589_s1 + $0x110] sm:$0xff] }
  0x91   : > { %478 = vmatpush.msra.mxu2 %v429_v8  ;;  %438 = vmatpush.msra.mxu0 %v427_v11  ;;  %v420_v19 = vld [vmem:[%s1589_s1 + $0x100] sm:$0xff]  ;;  %v418_v20 = vld [vmem:[%s1589_s1 + $0xf0] sm:$0xff]  ;;  %v419_v21 = vld [vmem:[%s1589_s1 + $0xf8] sm:$0xff] }
  0x92   : > { %458 = vmatpush.msra.mxu1 %v428_v12  ;;  %v417_v22 = vld [vmem:[%s1589_s1 + $0xe8] sm:$0xff]  ;;  %v415_v23 = vld [vmem:[%s1589_s1 + $0xd8] sm:$0xff]  ;;  %v416_v24 = vld [vmem:[%s1589_s1 + $0xe0] sm:$0xff]  ;;  %p753_p4 = scmp.ne.s32.totalorder %s1813_s9, 3 }
  0x93   : > { %479 = vmatpush.msra.mxu2 %v426_v13  ;;  %439 = vmatpush.msra.mxu0 %v424_v14  ;;  %v414_v25 = vld [vmem:[%s1589_s1 + $0xd0] sm:$0xff]  ;;  %v412_v26 = vld [vmem:[%s1589_s1 + $0xc0] sm:$0xff]  ;;  %v413_v27 = vld [vmem:[%s1589_s1 + $0xc8] sm:$0xff] }
  0x94   : > { %459 = vmatpush.msra.mxu1 %v425_v15  ;;  %v411_v28 = vld [vmem:[%s1589_s1 + $0xb8] sm:$0xff]  ;;  %v409_v29 = vld [vmem:[%s1589_s1 + $0xa8] sm:$0xff]  ;;  %v410_v30 = vld [vmem:[%s1589_s1 + $0xb0] sm:$0xff] }
  0x95   : > { %480 = vmatpush.msra.mxu2 %v423_v16  ;;  %440 = vmatpush.msra.mxu0 %v421_v17  ;;  %v408_v31 = vld [vmem:[%s1589_s1 + $0xa0] sm:$0xff]  ;;  %v406_v32 = vld [vmem:[%s1589_s1 + $0x90] sm:$0xff]  ;;  %v407_v33 = vld [vmem:[%s1589_s1 + $0x98] sm:$0xff] }
  0x96   : > { %460 = vmatpush.msra.mxu1 %v422_v18  ;;  %v405_v34 = vld [vmem:[%s1589_s1 + $0x88] sm:$0xff]  ;;  %v403_v35 = vld [vmem:[%s1589_s1 + $0x78] sm:$0xff]  ;;  %v404_v36 = vld [vmem:[%s1589_s1 + $0x80] sm:$0xff] }
  0x97   : > { %481 = vmatpush.msra.mxu2 %v420_v19  ;;  %441 = vmatpush.msra.mxu0 %v418_v20  ;;  %v402_v37 = vld [vmem:[%s1589_s1 + $0x70] sm:$0xff]  ;;  %v400_v38 = vld [vmem:[%s1589_s1 + $0x60] sm:$0xff]  ;;  %v401_v39 = vld [vmem:[%s1589_s1 + $0x68] sm:$0xff] }
  0x98   : > { %461 = vmatpush.msra.mxu1 %v419_v21  ;;  %v399_v40 = vld [vmem:[%s1589_s1 + $0x58] sm:$0xff]  ;;  %v397_v41 = vld [vmem:[%s1589_s1 + $0x48] sm:$0xff]  ;;  %v398_v42 = vld [vmem:[%s1589_s1 + $0x50] sm:$0xff] }
  0x99   : > { %482 = vmatpush.msra.mxu2 %v417_v22  ;;  %442 = vmatpush.msra.mxu0 %v415_v23  ;;  %v396_v43 = vld [vmem:[%s1589_s1 + $0x40] sm:$0xff]  ;;  %v394_v44 = vld [vmem:[%s1589_s1 + $0x30] sm:$0xff]  ;;  %v395_v45 = vld [vmem:[%s1589_s1 + $0x38] sm:$0xff] }
  0x9a   : > { %462 = vmatpush.msra.mxu1 %v416_v24  ;;  %v393_v46 = vld [vmem:[%s1589_s1 + $0x28] sm:$0xff]  ;;  %v391_v47 = vld [vmem:[%s1589_s1 + $0x18] sm:$0xff]  ;;  %v392_v48 = vld [vmem:[%s1589_s1 + $0x20] sm:$0xff] }
  0x9b   : > { %483 = vmatpush.msra.mxu2 %v414_v25  ;;  %443 = vmatpush.msra.mxu0 %v412_v26  ;;  %v390_v49 = vld [vmem:[%s1589_s1 + $0x10] sm:$0xff]  ;;  %v388_v51 = vld [vmem:[%s1589_s1] sm:$0xff]  ;;  %v389_v52 = vld [vmem:[%s1589_s1 + $0x8] sm:$0xff] }
  0x9c   : > { %463 = vmatpush.msra.mxu1 %v413_v27  ;;  %v387_v50 = vld [vmem:[%s295_s13] sm:$0xff]  ;;  %v384_v53 = vld [vmem:[#allocation2 + $0x10] sm:$0xff]  ;;  %v386_v59 = vld [vmem:[#allocation2 + $0x8] sm:$0xff] }
  0x9d   : > { %484 = vmatpush.msra.mxu2 %v411_v28  ;;  %444 = vmatpush.msra.mxu0 %v409_v29  ;;  %v385_v54 = vld [vmem:[#allocation2] sm:$0xff] }
  0x9e   : > { %464 = vmatpush.msra.mxu1 %v410_v30 }
  0x9f   : > { %485 = vmatpush.msra.mxu2 %v408_v31  ;;  %445 = vmatpush.msra.mxu0 %v406_v32 }
  0xa0   : > { %465 = vmatpush.msra.mxu1 %v407_v33 }
  0xa1   : > { %486 = vmatpush.msra.mxu2 %v405_v34  ;;  %446 = vmatpush.msra.mxu0 %v403_v35 }
  0xa2   : > { %466 = vmatpush.msra.mxu1 %v404_v36 }
  0xa3   : > { %487 = vmatpush.msra.mxu2 %v402_v37  ;;  %447 = vmatpush.msra.mxu0 %v400_v38 }
  0xa4   : > { %467 = vmatpush.msra.mxu1 %v401_v39 }
  0xa5   : > { %488 = vmatpush.msra.mxu2 %v399_v40  ;;  %448 = vmatpush.msra.mxu0 %v397_v41 }
  0xa6   : > { %468 = vmatpush.msra.mxu1 %v398_v42 }
  0xa7   : > { %489 = vmatpush.msra.mxu2 %v396_v43  ;;  %449 = vmatpush.msra.mxu0 %v394_v44 }
  0xa8   : > { %469 = vmatpush.msra.mxu1 %v395_v45 }
  0xa9   : > { %490 = vmatpush.msra.mxu2 %v393_v46  ;;  %450 = vmatpush.msra.mxu0 %v391_v47 }
  0xaa   : > { %470 = vmatpush.msra.mxu1 %v392_v48 }
  0xab   : > { %491 = vmatpush.msra.mxu2 %v390_v49  ;;  %451 = vmatpush.msra.mxu0 %v388_v51 }
  0xac   : > { %492 = vmatmul.f32.vlgmr.msra.gmra.mxu2 %v387_v50  ;;  %471 = vmatpush.msra.mxu1 %v389_v52 }
  0xad   : > { %452 = vmatmul.f32.vlgmr.msra.gmra.mxu0 %v387_v50  ;;  %472 = vmatmul.f32.vlgmr.msra.gmra.mxu1 %v387_v50 }
 0x12a   : > { %v453_v55 = vpop.f32.mrf.mxu0  ;;  %v473_v57 = vpop.f32.mrf.mxu1 }
 0x12b   : > { %v496_v56 = vadd.f32 %v453_v55, %v384_v53  ;;  %v497_v58 = vadd.f32 %v473_v57, %v385_v54 }
 0x12d   : > { %499 = vst [vmem:[#allocation2 + $0x10] sm:$0xff] %v496_v56 }
 0x12e   : > { %500 = vst [vmem:[#allocation2] sm:$0xff] %v497_v58  ;;  %505 = sbr.rel (%p753_p4) target bundleno = 353 (0x161), region = 60 }
 0x12f   : > { %v493_v60 = vpop.f32.mrf.mxu2 }
 0x130   : > { %v498_v61 = vadd.f32 %v493_v60, %v386_v59 }
 0x132   : > { %501 = vst [vmem:[#allocation2 + $0x8] sm:$0xff] %v498_v61 }
 0x133   : > { %v550_v28 = vld [vmem:[%s1605_s3] sm:$0xff] }
 0x134   : > { %v506_v62 = vld [vmem:[#allocation2 + $0x10] sm:$0xff] }
 0x135   : > { %v754_v0 = vmul.f32 -1.442695, %v506_v62  ;;  %v507_v18 = vld [vmem:[#allocation2] sm:$0xff] }
 0x137   : > { %950 = vpow2.f32 %v754_v0 }
 0x139   : > { %v508_v63 = vld [vmem:[#allocation2 + $0x8] sm:$0xff] }
 0x13a   : > { %v530_v1 = vadd.f32 -1.0, %v508_v63 }
 0x13c   : > { %v755_v2 = vmul.f32 -1.442695, %v530_v1 }
 0x13d   : > { %v951_v3 = vpop.eup %950 }
 0x13e   : > { %952 = vpow2.f32 %v755_v2  ;;  %v512_v4 = vadd.f32 1.0, %v951_v3 }
 0x140   : > { %954 = vrcp.f32 %v512_v4  ;;  %v524_v9 = vand.u32 2147483648, %v512_v4  ;;  %vm518_vm0 = vweird.f32 %v512_v4  ;;  %v522_v12 = vand.u32 2147483647, %v512_v4 }
 0x142   : > { %v525_v15 = vor.u32 1.1754944e-38, %v524_v9  ;;  %vm523_vm3 = vcmp.eq.f32.partialorder %v522_v12, 8.507059e+37 }
 0x144   : > { %v953_v5 = vpop.eup %952 }
 0x145   : > { %v534_v6 = vadd.f32 1.0, %v953_v5 }
 0x146   : > { %v955_v7 = vpop.eup %954 }
 0x147   : > { %956 = vrcp.f32 %v534_v6  ;;  %v514_v8 = vmul.f32 %v955_v7, %v512_v4  ;;  %vm519_vm1 = vweird.f32 %v955_v7  ;;  %vm540_vm4 = vweird.f32 %v534_v6 }
 0x148   : > { %vm520_vm2 = vmor %vm518_vm0, %vm519_vm1  ;;  %v546_v23 = vand.u32 2147483648, %v534_v6  ;;  %v544_v25 = vand.u32 2147483647, %v534_v6 }
 0x149   : > { %v515_v11 = vsub.f32 1.0, %v514_v8 }
 0x14a   : > { %v547_v26 = vor.u32 1.1754944e-38, %v546_v23  ;;  %vm545_vm7 = vcmp.eq.f32.partialorder %v544_v25, 8.507059e+37 }
 0x14b   : > { %v516_v14 = vmul.f32 %v955_v7, %v515_v11 }
 0x14d   : > { %v957_v10 = vpop.eup %956  ;;  %v517_v17 = vadd.f32 %v955_v7, %v516_v14 }
 0x14e   : > { %v536_v13 = vmul.f32 %v957_v10, %v534_v6  ;;  %vm541_vm5 = vweird.f32 %v957_v10 }
 0x14f   : > { %v521_v20 = vsel %vm520_vm2, %v955_v7, %v517_v17  ;;  %vm542_vm6 = vmor %vm540_vm4, %vm541_vm5 }
 0x150   : > { %v537_v16 = vsub.f32 1.0, %v536_v13  ;;  %v526_v21 = vsel %vm523_vm3, %v525_v15, %v521_v20 }
 0x151   : > { %v528_v22 = vmul.f32 %v526_v21, %v507_v18 }
 0x152   : > { %v538_v19 = vmul.f32 %v957_v10, %v537_v16 }
 0x153   : > { %958 = vtanh.f32 %v528_v22 }
 0x154   : > { %v539_v24 = vadd.f32 %v957_v10, %v538_v19 }
 0x156   : > { %v543_v27 = vsel %vm542_vm6, %v957_v10, %v539_v24 }
 0x157   : > { %v548_v30 = vsel %vm545_vm7, %v547_v26, %v543_v27 }
 0x159   : > { %v959_v29 = vpop.eup %958 }
 0x15a   : > { %v551_v31 = vsub.f32 %v959_v29, %v550_v28 }
 0x15c   : > { %v552_v32 = vmul.f32 %v551_v31, %v548_v30 }
 0x15e   : > { %v553_v33 = vadd.f32 %v552_v32, %v550_v28 }
 0x160   : > { %554 = vst [vmem:[%s1611_s2] sm:$0xff] %v553_v33 }
 0x161 PF: > { %s1814_s24 = sld [smem:[#allocation22_spill]]  ;;  %s570_s6 = sshll.u32 %s1611_s2, 4  ;;  %s571_s6 = int_to_ptr.vmem [resolvable:$true] %s570_s6 }
 0x162   : > { %s1815_s18 = sld [smem:[#allocation21_spill]]  ;;  %s556_s12 = scalar_lea.sflag [#allocation5], %s1601_s29 }
 0x163   : > { %s1816_s1 = sld [smem:[#allocation36_spill]] }
 0x167   : > { %s757_s13 = sshll.u32 %s1814_s24, 1 }
 0x168   : > { %s566_s30 = sadd.s32 %s1815_s18, %s757_s13 }
 0x169   : > { %s758_s10 = sshll.u32 %s566_s30, 3  ;;  %s1100_s2 = scalar_lea.hbm %s1816_s1, 32 }
 0x16a   : > { %s568_s22 = scalar_lea.hbm %s1816_s1, %s758_s10 }
 0x16b   : > { %s572_s11 = sshll.u32 %s568_s22, 4  ;;  %s573_s11 = int_to_ptr.hbm [resolvable:$true] %s572_s11 }
 0x16c   : > { %s1094_s25 = sshra.s32 %s573_s11, 4  ;;  %s1095_s25 = int_to_ptr.hbm [resolvable:$true] %s1094_s25 }
 0x16d   : > { %s1096_s14 = scalar_lea.hbm %s1095_s25, 8  ;;  %p1101_p10 = scmp.lt.s32.totalorder %s1095_s25, %s1816_s1 }
 0x16e   : > { %p1097_p7 = scmp.ne.s32.totalorder %s1095_s25, %s1096_s14  ;;  %p1102_p12 = scmp.lt.s32.totalorder %s1100_s2, %s1096_s14 }
 0x170   : > { %p1098_p5 = pnand %p1097_p7, %p1561_p3  ;;  %p1103_p13 = por %p1102_p12, %p1101_p10 }
 0x172   : > { %p1099_p2 = pneg %p1098_p5 }
 0x174   : > { %p1104_p11 = pnand %p1103_p13, %p1099_p2 }
 0x176   : > { %1107 = shalt.err (!%p1104_p11)
}
 0x177   : > { %774 = dma.vmem_to_hbm [thread:$0]  (%p1561_p3), %s571_s6, 128, %s573_s11, %s556_s12  }
 0x178 PF: > { %p794_p6 = scmp.ge.s32.totalorder %s1278_s7, 2  ;;  %s584_s29 = sand.u32 1, %s1206_s15  }
 0x179   : > { %s585_s18 = scalar_lea.sflag [#allocation5], %s584_s29 }
 0x17a   : > { %p790_p0 = pnand %p794_p6, %p1565_p9 }
 0x17c   : > { %p791_p1 = pneg %p790_p0 }
 0x17e   : > { %1201 = dma.done.wait (%p791_p1), %s585_s18, 128  }
 0x17f   : > { %1203 = vsyncadd (%p791_p1), %s585_s18, 4294967168  ;;  %s26_s7 = sadd.s32 1, %s1278_s7   ;;  %s1818_s21 = sld [smem:[#allocation17_spill]] }
 0x180   : > { %p1689_p8 = scmp.ge.s32.totalorder %s26_s7, 18   ;;  %s1819_s22 = sld [smem:[#allocation18_spill]] }
 0x181   : > { %s1820_s28 = sld [smem:[#allocation30_spill]]  ;;  %s1826_s15 = smov %s1210_s16 }
 0x182   : > { %s1821_s24 = sld [smem:[#allocation19_spill]]  ;;  %s1828_s16 = smov %s1214_s17 }
 0x183   : > { %s1822_s30 = sld [smem:[#allocation31_spill]]  ;;  %s1830_s17 = smov %s1544_s23 }
 0x184   : > { %s1823_s27 = sld [smem:[#allocation23_spill]]  ;;  %s1831_s18 = smov %s1222_s19 }
 0x185   : > { %s1824_s29 = sld [smem:[#allocation24_spill]]  ;;  %s1832_s19 = smov %s1226_s20 }
 0x186   : > { %s1825_s6 = sld [smem:[#allocation25_spill]]  ;;  %s1833_s20 = smov %s1516_s8 }
 0x187   : > { %s1827_s10 = sld [smem:[#allocation26_spill]]  ;;  %s1834_s23 = smov %s1820_s28 }
 0x188   : > { %s1829_s4 = sld [smem:[#allocation29_spill]]  ;;  %s1835_s25 = smov %s1250_s26 }
 0x189   : > { %s1836_s26 = smov %s1822_s30  ;;  %s1837_s28 = smov %s1270_s5 }
 0x18a   :  { %25 = sbr.rel (!%p1689_p8) target bundleno = 23 (0x17), region = 126 }
 0x18c   : > { %s1838_s30 = smov %s1825_s6 }
 0x18d   : > { %s1839_s5 = smov %s1827_s10 }
 0x18e   : > { %s1840_s6 = smov %s1829_s4 }
 0x18f   :  { %591 = vsyncpa [#allocation4], 1 }
 0x190   :  { %593 = vsyncpa [#allocation4 + $0x1], 1 }
 0x191   :  { %594 = vsyncpa [#allocation7], 1 }
 0x192   :  { %596 = vsyncpa [#allocation7 + $0x1], 1 }
 0x193   :  { %597 = vsyncpa [#allocation10], 1 }
 0x194   :  { %599 = vsyncpa [#allocation10 + $0x1], 1 }
 0x195   :  { %600 = vsyncpa [#allocation5], 1 }
 0x196   :  { %602 = vsyncpa [#allocation5 + $0x1], 1 }

</bundles_post_ra>
